<compile_context>
chip_gen: v5e
topology: v5e:2x2
jax: 0.10.0
libtpu: 0.0.40
codegen_flags: <defaults>
</compile_context>

<pallas_src>
import jax
import jax.numpy as jnp
from jax.experimental import pallas as pl
from jax.experimental.pallas import tpu as pltpu


def _round_up(n, m):
    return ((n + m - 1) // m) * m


def _sigmoid(x):
    # sigmoid(x) = 0.5 * tanh(0.5 * x) + 0.5 -> single EUP push per element;
    # the scale/shift are cheap VALU ops.
    return 0.5 * jnp.tanh(0.5 * x) + 0.5


def mlp_kernel(x_ref, w1_ref, b1_ref, w2_ref, b2_ref, w3_ref, b3_ref, o_ref):
    # One fused pass over a batch tile. Matmul operands bf16, accumulation f32.
    x = x_ref[...].astype(jnp.bfloat16)                               # in-kernel cast

    h1 = jnp.dot(x, w1_ref[...], preferred_element_type=jnp.float32) + b1_ref[...]
    h1 = _sigmoid(h1)                                                 # (bt, 128) f32

    h2 = jnp.dot(h1.astype(jnp.bfloat16), w2_ref[...],
                 preferred_element_type=jnp.float32) + b2_ref[...]
    h2 = _sigmoid(h2)                                                 # (bt, 256) f32

    out = jnp.dot(h2.astype(jnp.bfloat16), w3_ref[...],
                  preferred_element_type=jnp.float32) + b3_ref[...]   # (bt, 128) lane-dense
    o_ref[...] = out.astype(o_ref.dtype)


def prepare_params(params):
    """One-time preprocessing (hoisted out of the per-call path).

    Casts weights to bf16 and zero-pads the final layer to 128 output lanes so
    the kernel's final matmul/store is lane-dense and unmasked. Call this once
    (e.g. right after loading/initialising the model) and reuse the result for
    every forward call.
    """
    w3, b3 = params["w3"], params["b3"]
    class_num = w3.shape[1]
    n_out = _round_up(class_num, 128)
    pad = ((0, 0), (0, n_out - class_num))
    return {
        "w1": params["w1"].astype(jnp.bfloat16),
        "b1": params["b1"].astype(jnp.float32),
        "w2": params["w2"].astype(jnp.bfloat16),
        "b2": params["b2"].astype(jnp.float32),
        "w3": jnp.pad(w3, pad).astype(jnp.bfloat16),
        "b3": jnp.pad(b3, pad).astype(jnp.float32),
        "class_num": class_num,
    }


def _select_batch_tile(B, batch_tile):
    """Pick the batch tile: balanced across steps, multiple of 16 rows."""
    n_steps = pl.cdiv(B, batch_tile)
    # v7x has 2 TensorCores; give the "parallel" batch axis >= 2 grid steps for
    # mid-size batches so both cores are used. (For tiny B the fixed per-step
    # overhead dominates, so keep a single step there.)
    if B >= 256 and n_steps < 2:
        n_steps = 2
    # Balance the tile across n_steps (avoids ~2x padding waste when B is just
    # above a tile multiple) and round to 16 rows for bf16 sublane packing.
    return _round_up(pl.cdiv(B, n_steps), 16)


def phone_price_forward(x, params, *, batch_tile=1024, out_dtype=jnp.float32):
    """x: (B, input_dim) float32. params: output of prepare_params() (raw f32
    params are also accepted and prepared on the fly, but that re-introduces the
    per-call cast/pad ops -- prefer preparing once).

    Returns (B, class_num) float32 logits, matching the torch model up to bf16
    matmul-input rounding. Set out_dtype=jnp.bfloat16 to halve the output HBM
    stream for large-batch serving (logits lose ~3 decimal digits).
    """
    if "class_num" not in params:
        params = prepare_params(params)

    B, input_dim = x.shape
    w1, b1 = params["w1"], params["b1"]
    w2, b2 = params["w2"], params["b2"]
    w3, b3 = params["w3"], params["b3"]
    class_num = params["class_num"]
    n_out = w3.shape[1]                         # 128-lane-padded output width

    # --- batch tiling: balanced tiles, pad the batch up to a tile multiple.
    bt = _select_batch_tile(B, batch_tile)
    B_pad = _round_up(B, bt)
    if B_pad != B:
        x = jnp.pad(x, ((0, B_pad - B), (0, 0)))
    grid = (B_pad // bt,)

    # Weights/biases: full resident blocks with constant index maps (DMA'd once).
    full = lambda arr: pl.BlockSpec(arr.shape, lambda i: (0,) * arr.ndim)

    out_pad = pl.pallas_call(
        mlp_kernel,
        out_shape=jax.ShapeDtypeStruct((B_pad, n_out), out_dtype),
        grid_spec=pl.GridSpec(
            grid=grid,
            in_specs=[
                pl.BlockSpec((bt, input_dim), lambda i: (i, 0)),
                full(w1), full(b1),
                full(w2), full(b2),
                full(w3), full(b3),
            ],
            out_specs=pl.BlockSpec((bt, n_out), lambda i: (i, 0)),
        ),
        compiler_params=pltpu.CompilerParams(
            dimension_semantics=("parallel",),
        ),
    )(x, w1, b1, w2, b2, w3, b3)

    out = out_pad[:B, :class_num]
    return out if out.dtype == jnp.float32 else out.astype(jnp.float32)


def init_params(key, input_dim, class_num):
    """Deterministic init mimicking nn.Linear (uniform +/- 1/sqrt(fan_in)).
    Weights stored as (in_features, out_features)."""
    dims = [(input_dim, 128), (128, 256), (256, class_num)]
    params = {}
    for idx, (fan_in, fan_out) in enumerate(dims, start=1):
        key, kw, kb = jax.random.split(key, 3)
        bound = 1.0 / jnp.sqrt(jnp.float32(fan_in))
        params[f"w{idx}"] = jax.random.uniform(
            kw, (fan_in, fan_out), jnp.float32, minval=-bound, maxval=bound
        )
        params[f"b{idx}"] = jax.random.uniform(
            kb, (1, fan_out), jnp.float32, minval=-bound, maxval=bound
        )
    return params


def reference_forward(x, params):
    """Pure-JAX reference mirroring the kernel's bf16 matmul inputs / f32 accum
    (exact sigmoid, same as the kernel's tanh form)."""
    def mm(a, w):
        return jnp.dot(a.astype(jnp.bfloat16), w.astype(jnp.bfloat16),
                       preferred_element_type=jnp.float32)
    h1 = jax.nn.sigmoid(mm(x, params["w1"]) + params["b1"])
    h2 = jax.nn.sigmoid(mm(h1, params["w2"]) + params["b2"])
    return mm(h2, params["w3"]) + params["b3"]


if __name__ == "__main__":
    key = jax.random.PRNGKey(0)
    B, input_dim, class_num = 16, 20, 4  # phone-price dataset: 20 features, 4 classes

    k_x, k_p = jax.random.split(key)
    x = jax.random.normal(k_x, (B, input_dim), jnp.float32)
    params = init_params(k_p, input_dim, class_num)

    # One-time preprocessing (bf16 cast + lane padding) -- cached across calls.
    prepared = prepare_params(params)

    out = phone_price_forward(x, prepared)
    out = jax.block_until_ready(out)

    ref = reference_forward(x, params)
    assert out.shape == (B, class_num), out.shape
    assert jnp.allclose(out, ref, atol=1e-2, rtol=1e-2), "mismatch vs JAX reference"

    print("KERNEL_OK")
</pallas_src>

<mosaic_0001>
module attributes {stable_mosaic.version = 11 : i64} {
  func.func @mlp_kernel(%arg0: i32, %arg1: memref<16x20xf32, #tpu.memory_space<vmem>>, %arg2: memref<20x128xbf16, #tpu.memory_space<vmem>>, %arg3: memref<1x128xf32, #tpu.memory_space<vmem>>, %arg4: memref<128x256xbf16, #tpu.memory_space<vmem>>, %arg5: memref<1x256xf32, #tpu.memory_space<vmem>>, %arg6: memref<256x128xbf16, #tpu.memory_space<vmem>>, %arg7: memref<1x128xf32, #tpu.memory_space<vmem>>, %arg8: memref<16x128xf32, #tpu.memory_space<vmem>>) attributes {dimension_semantics = [#tpu.dimension_semantics<parallel>], iteration_bounds = array<i64: 1>, scalar_prefetch = 0 : i64, scratch_operands = 0 : i64, tpu.core_type = #tpu.core_type<tc>, window_params = [{transform_indices = @transform_0, window_bounds = array<i64: 16, 20>}, {pipeline_mode = #tpu.pipeline_mode<synchronous>, transform_indices = @transform_1, window_bounds = array<i64: 20, 128>}, {pipeline_mode = #tpu.pipeline_mode<synchronous>, transform_indices = @transform_2, window_bounds = array<i64: 1, 128>}, {pipeline_mode = #tpu.pipeline_mode<synchronous>, transform_indices = @transform_3, window_bounds = array<i64: 128, 256>}, {pipeline_mode = #tpu.pipeline_mode<synchronous>, transform_indices = @transform_4, window_bounds = array<i64: 1, 256>}, {pipeline_mode = #tpu.pipeline_mode<synchronous>, transform_indices = @transform_5, window_bounds = array<i64: 256, 128>}, {pipeline_mode = #tpu.pipeline_mode<synchronous>, transform_indices = @transform_6, window_bounds = array<i64: 1, 128>}, {transform_indices = @transform_7, window_bounds = array<i64: 16, 128>}]} {
    %c0 = arith.constant 0 : index
    %c0_0 = arith.constant 0 : index
    %0 = vector.load %arg1[%c0, %c0_0] : memref<16x20xf32, #tpu.memory_space<vmem>>, vector<16x20xf32>
    %1 = arith.truncf %0 : vector<16x20xf32> to vector<16x20xbf16>
    %c0_1 = arith.constant 0 : index
    %c0_2 = arith.constant 0 : index
    %2 = vector.load %arg2[%c0_1, %c0_2] : memref<20x128xbf16, #tpu.memory_space<vmem>>, vector<20x128xbf16>
    %cst = arith.constant dense<0.000000e+00> : vector<16x128xf32>
    %3 = tpu.matmul %1, %2, %cst {dimension_numbers = #tpu.dot_dimension_numbers<[1], [0], [0], [1], [0, 0, 1, 1], [], []>} : vector<16x20xbf16>, vector<20x128xbf16>, vector<16x128xf32> -> vector<16x128xf32>
    %c0_3 = arith.constant 0 : index
    %c0_4 = arith.constant 0 : index
    %4 = vector.load %arg3[%c0_3, %c0_4] : memref<1x128xf32, #tpu.memory_space<vmem>>, vector<1x128xf32>
    %5 = vector.broadcast %4 : vector<1x128xf32> to vector<16x128xf32>
    %6 = arith.addf %3, %5 : vector<16x128xf32>
    %cst_5 = arith.constant 5.000000e-01 : f32
    %7 = vector.broadcast %cst_5 : f32 to vector<16x128xf32>
    %8 = arith.mulf %7, %6 : vector<16x128xf32>
    %9 = math.tanh %8 : vector<16x128xf32>
    %cst_6 = arith.constant 5.000000e-01 : f32
    %10 = vector.broadcast %cst_6 : f32 to vector<16x128xf32>
    %11 = arith.mulf %10, %9 : vector<16x128xf32>
    %cst_7 = arith.constant 5.000000e-01 : f32
    %12 = vector.broadcast %cst_7 : f32 to vector<16x128xf32>
    %13 = arith.addf %11, %12 : vector<16x128xf32>
    %14 = arith.truncf %13 : vector<16x128xf32> to vector<16x128xbf16>
    %c0_8 = arith.constant 0 : index
    %c0_9 = arith.constant 0 : index
    %15 = vector.load %arg4[%c0_8, %c0_9] : memref<128x256xbf16, #tpu.memory_space<vmem>>, vector<128x256xbf16>
    %cst_10 = arith.constant dense<0.000000e+00> : vector<16x256xf32>
    %16 = tpu.matmul %14, %15, %cst_10 {dimension_numbers = #tpu.dot_dimension_numbers<[1], [0], [0], [1], [0, 0, 1, 1], [], []>} : vector<16x128xbf16>, vector<128x256xbf16>, vector<16x256xf32> -> vector<16x256xf32>
    %c0_11 = arith.constant 0 : index
    %c0_12 = arith.constant 0 : index
    %17 = vector.load %arg5[%c0_11, %c0_12] : memref<1x256xf32, #tpu.memory_space<vmem>>, vector<1x256xf32>
    %18 = vector.broadcast %17 : vector<1x256xf32> to vector<16x256xf32>
    %19 = arith.addf %16, %18 : vector<16x256xf32>
    %cst_13 = arith.constant 5.000000e-01 : f32
    %20 = vector.broadcast %cst_13 : f32 to vector<16x256xf32>
    %21 = arith.mulf %20, %19 : vector<16x256xf32>
    %22 = math.tanh %21 : vector<16x256xf32>
    %cst_14 = arith.constant 5.000000e-01 : f32
    %23 = vector.broadcast %cst_14 : f32 to vector<16x256xf32>
    %24 = arith.mulf %23, %22 : vector<16x256xf32>
    %cst_15 = arith.constant 5.000000e-01 : f32
    %25 = vector.broadcast %cst_15 : f32 to vector<16x256xf32>
    %26 = arith.addf %24, %25 : vector<16x256xf32>
    %27 = arith.truncf %26 : vector<16x256xf32> to vector<16x256xbf16>
    %c0_16 = arith.constant 0 : index
    %c0_17 = arith.constant 0 : index
    %28 = vector.load %arg6[%c0_16, %c0_17] : memref<256x128xbf16, #tpu.memory_space<vmem>>, vector<256x128xbf16>
    %cst_18 = arith.constant dense<0.000000e+00> : vector<16x128xf32>
    %29 = tpu.matmul %27, %28, %cst_18 {dimension_numbers = #tpu.dot_dimension_numbers<[1], [0], [0], [1], [0, 0, 1, 1], [], []>} : vector<16x256xbf16>, vector<256x128xbf16>, vector<16x128xf32> -> vector<16x128xf32>
    %c0_19 = arith.constant 0 : index
    %c0_20 = arith.constant 0 : index
    %30 = vector.load %arg7[%c0_19, %c0_20] : memref<1x128xf32, #tpu.memory_space<vmem>>, vector<1x128xf32>
    %31 = vector.broadcast %30 : vector<1x128xf32> to vector<16x128xf32>
    %32 = arith.addf %29, %31 : vector<16x128xf32>
    %c0_21 = arith.constant 0 : index
    %c0_22 = arith.constant 0 : index
    %33 = vector.load %arg8[%c0_21, %c0_22] : memref<16x128xf32, #tpu.memory_space<vmem>>, vector<16x128xf32>
    tpu.vector_store %arg8[%c0_21, %c0_22], %32 {strides = array<i32>} : memref<16x128xf32, #tpu.memory_space<vmem>>, vector<16x128xf32>,
    return
  }
  func.func @transform_0(%arg0: i32) -> (i32, i32) {
    %c0_i32 = arith.constant 0 : i32
    %c0_i32_0 = arith.constant 0 : i32
    return %arg0, %c0_i32 : i32, i32
  }
  func.func @transform_1(%arg0: i32) -> (i32, i32) {
    %c0_i32 = arith.constant 0 : i32
    %c0_i32_0 = arith.constant 0 : i32
    %c0_i32_1 = arith.constant 0 : i32
    return %c0_i32, %c0_i32_0 : i32, i32
  }
  func.func @transform_2(%arg0: i32) -> (i32, i32) {
    %c0_i32 = arith.constant 0 : i32
    %c0_i32_0 = arith.constant 0 : i32
    %c0_i32_1 = arith.constant 0 : i32
    return %c0_i32, %c0_i32_0 : i32, i32
  }
  func.func @transform_3(%arg0: i32) -> (i32, i32) {
    %c0_i32 = arith.constant 0 : i32
    %c0_i32_0 = arith.constant 0 : i32
    %c0_i32_1 = arith.constant 0 : i32
    return %c0_i32, %c0_i32_0 : i32, i32
  }
  func.func @transform_4(%arg0: i32) -> (i32, i32) {
    %c0_i32 = arith.constant 0 : i32
    %c0_i32_0 = arith.constant 0 : i32
    %c0_i32_1 = arith.constant 0 : i32
    return %c0_i32, %c0_i32_0 : i32, i32
  }
  func.func @transform_5(%arg0: i32) -> (i32, i32) {
    %c0_i32 = arith.constant 0 : i32
    %c0_i32_0 = arith.constant 0 : i32
    %c0_i32_1 = arith.constant 0 : i32
    return %c0_i32, %c0_i32_0 : i32, i32
  }
  func.func @transform_6(%arg0: i32) -> (i32, i32) {
    %c0_i32 = arith.constant 0 : i32
    %c0_i32_0 = arith.constant 0 : i32
    %c0_i32_1 = arith.constant 0 : i32
    return %c0_i32, %c0_i32_0 : i32, i32
  }
  func.func @transform_7(%arg0: i32) -> (i32, i32) {
    %c0_i32 = arith.constant 0 : i32
    %c0_i32_0 = arith.constant 0 : i32
    return %arg0, %c0_i32 : i32, i32
  }
}

</mosaic_0001>

<bundles_post_ra>
// kernel: tpu_custom_call.1
= control target key start
LH: loop header
LB: loop body
LE: loop exit
PB: predicated region body
PF: predicated region fallthrough
CT: control target
= control target key end

     0   :  { %12 = vsyncpa [#allocation3], 0  ;;  %s871_s0 = inlined_call_operand.hbm [shape: f32[16,20], index: 0, kind: input, shape index: {}]   ;;  %s872_s1 = inlined_call_operand.hbm [shape: bf16[20,128], index: 1, kind: input, shape index: {}]   ;;  %s873_s2 = inlined_call_operand.vmem [shape: f32[1,128], index: 2, kind: input, shape index: {}]   ;;  %s874_s3 = inlined_call_operand.hbm [shape: bf16[128,256], index: 3, kind: input, shape index: {}]   ;;  %s875_s4 = inlined_call_operand.vmem [shape: f32[1,256], index: 4, kind: input, shape index: {}]   ;;  %s876_s5 = inlined_call_operand.hbm [shape: bf16[256,128], index: 5, kind: input, shape index: {}]   ;;  %s877_s6 = inlined_call_operand.vmem [shape: f32[1,128], index: 6, kind: input, shape index: {}]   ;;  %s878_s7 = inlined_call_operand.hbm [shape: f32[16,128], index: 7, kind: output, shape index: {}]  }
   0x1   :  { %13 = vsyncpa [#allocation6], 0 }
   0x2   :  { %14 = vsyncpa [#allocation9], 0  ;;  %s33_s26 = sshll.u32 %s872_s1, 4  ;;  %s34_s26 = int_to_ptr.hbm [resolvable:$true] %s33_s26 }
   0x3   :  { %15 = vsyncpa [#allocation4], 0  ;;  %s789_s27 = smov [#allocation5]   ;;  %s20_s8 = sshll.u32 %s871_s0, 4  ;;  %s21_s8 = int_to_ptr.hbm [resolvable:$true] %s20_s8 }
   0x4   :  { %s35_s28 = sshll.u32 %s789_s27, 4  ;;  %s790_s9 = smov 64   ;;  %s36_s28 = int_to_ptr.vmem [resolvable:$true] %s35_s28 }
   0x5   :  { %s791_s10 = smov 4   ;;  %s792_s11 = smov [#allocation2]  }
   0x6   :  { %41 = dma.hbm_to_vmem [thread:$0]  %s34_s26, 192, %s36_s28, [#allocation6], %s790_s9, %s790_s9, %s791_s10  }
   0x7   :  { %s22_s12 = sshll.u32 %s792_s11, 4  ;;  %s793_s13 = smov 128   ;;  %s23_s12 = int_to_ptr.vmem [resolvable:$true] %s22_s12 }
   0x8   :  { %s794_s14 = smov 8   ;;  %s48_s16 = sshll.u32 %s874_s3, 4  ;;  %s49_s16 = int_to_ptr.hbm [resolvable:$true] %s48_s16 }
   0x9   :  { %28 = dma.hbm_to_vmem [thread:$0]  %s21_s8, 256, %s23_s12, [#allocation3], %s793_s13, %s793_s13, %s794_s14  }
   0xa   :  { %s795_s17 = smov [#allocation7]   ;;  %s63_s20 = sshll.u32 %s876_s5, 4  ;;  %s64_s20 = int_to_ptr.hbm [resolvable:$true] %s63_s20 }
   0xb   :  { %s50_s0 = sshll.u32 %s795_s17, 4  ;;  %s796_s21 = smov [#allocation8]   ;;  %s51_s0 = int_to_ptr.vmem [resolvable:$true] %s50_s0 }
   0xc   :  { %56 = dma.hbm_to_vmem [thread:$0]  %s49_s16, 2048, %s51_s0, [#allocation6], %s793_s13, %s793_s13, %s794_s14  }
   0xd   :  { %s65_s22 = sshll.u32 %s796_s21, 4  ;;  %s66_s22 = int_to_ptr.vmem [resolvable:$true] %s65_s22 }
   0xe   :  { %71 = dma.hbm_to_vmem [thread:$0]  %s64_s20, 2048, %s66_s22, [#allocation9], %s790_s9, %s790_s9, %s791_s10  }
   0xf   :  { %781 = dma.done.wait [#allocation3], 256  }
  0x10   :  { %782 = vsyncadd [#allocation3], 4294967040 }
  0x11   :  { %783 = dma.done.wait [#allocation6], 2240  }
  0x12   :  { %784 = vsyncadd [#allocation6], 4294965056 }
  0x13   :  { %785 = dma.done.wait [#allocation9], 2048  }
  0x14   :  { %786 = vsyncadd [#allocation9], 4294965248  ;;  %v96_v0 = vld [vmem:[#allocation5 + $0x8] sm:$0x3]  ;;  %vm114_vm0 = vcmask 1041408   ;;  %v605_v16 = vld [vmem:[#allocation5] sm:$0xff] }
  0x15   :  { %v106_v1 = vunpack.c.l.b16 %v96_v0  ;;  %v535_v2 = vld [vmem:[#allocation7 + $0x70] sm:$0xf]  ;;  %v621_v3 = vld [vmem:[#allocation7 + $0x74] sm:$0xf0]  ;;  %v620_v5 = vld [vmem:[#allocation7 + $0x74] sm:$0xf] }
  0x16   :  { %v536_v4 = vor.u32 %v621_v3, %v535_v2  ;;  %v537_v6 = vld [vmem:[#allocation7 + $0x78] sm:$0xf0]  ;;  %v527_v7 = vld [vmem:[#allocation7 + $0x60] sm:$0xf]  ;;  %v619_v10 = vld [vmem:[#allocation7 + $0x64] sm:$0xf0] }
  0x17   :  { %v108_v8 = vpack.c.b16 %v106_v1, %v106_v1  ;;  %v540_v9 = vor.u32 %v620_v5, %v537_v6  ;;  %v618_v11 = vld [vmem:[#allocation7 + $0x64] sm:$0xf]  ;;  %v529_v12 = vld [vmem:[#allocation7 + $0x68] sm:$0xf0]  ;;  %v528_v13 = vor.u32 %v619_v10, %v527_v7  ;;  %vm110_vm1 = vcmask 162816   ;;  %v629_v56 = vld [vmem:[#allocation8 + $0x38] sm:$0xff] }
  0x18   :  { %243 = vmatpush.bf16.msra.mxu1 %v536_v4  ;;  %v532_v15 = vor.u32 %v618_v11, %v529_v12  ;;  %v91_v17 = vld [vmem:[#allocation2] sm:$0xff]  ;;  %v92_v18 = vld [vmem:[#allocation2 + $0x8] sm:$0xff]  ;;  %v617_v21 = vld [vmem:[#allocation7 + $0x54] sm:$0xf0]  ;;  %421 = vmatpush.bf16.msra.mxu3 %v629_v56  ;;  %s797_s25 = smov [#allocation10]   ;;  %s457_s29 = sshll.u32 %s878_s7, 4  ;;  %s458_s29 = int_to_ptr.hbm [resolvable:$true] %s457_s29 }
  0x19   :  { %v116_v14 = vsel %vm114_vm0, %v108_v8, 0  ;;  %257 = vmatpush.bf16.msra.mxu2 %v540_v9  ;;  %v93_v19 = vpack.c.bf16 %v92_v18, %v91_v17  ;;  %v519_v20 = vld [vmem:[#allocation7 + $0x50] sm:$0xf]  ;;  %v616_v22 = vld [vmem:[#allocation7 + $0x54] sm:$0xf]  ;;  %v637_v8 = vld [vmem:[#allocation8 + $0x78] sm:$0xff] }
  0x1a   :  { %124 = vmatpush.bf16.msra.mxu0 %v116_v14  ;;  %v520_v23 = vor.u32 %v617_v21, %v519_v20  ;;  %v521_v24 = vld [vmem:[#allocation7 + $0x58] sm:$0xf0]  ;;  %v511_v26 = vld [vmem:[#allocation7 + $0x40] sm:$0xf]  ;;  %v615_v27 = vld [vmem:[#allocation7 + $0x44] sm:$0xf0] }
  0x1b   :  { %v524_v25 = vor.u32 %v616_v22, %v521_v24  ;;  %v614_v28 = vld [vmem:[#allocation7 + $0x44] sm:$0xf]  ;;  %v512_v29 = vor.u32 %v615_v27, %v511_v26  ;;  %v513_v30 = vld [vmem:[#allocation7 + $0x48] sm:$0xf0]  ;;  %v503_v32 = vld [vmem:[#allocation7 + $0x30] sm:$0xf] }
  0x1c   :  { %244 = vmatpush.bf16.msra.mxu1 %v528_v13  ;;  %v516_v31 = vor.u32 %v614_v28, %v513_v30  ;;  %v613_v33 = vld [vmem:[#allocation7 + $0x34] sm:$0xf0]  ;;  %v612_v34 = vld [vmem:[#allocation7 + $0x34] sm:$0xf]  ;;  %v505_v36 = vld [vmem:[#allocation7 + $0x38] sm:$0xf0] }
  0x1d   :  { %258 = vmatpush.bf16.msra.mxu2 %v532_v15  ;;  %v504_v35 = vor.u32 %v613_v33, %v503_v32  ;;  %v508_v37 = vor.u32 %v612_v34, %v505_v36  ;;  %v495_v38 = vld [vmem:[#allocation7 + $0x20] sm:$0xf]  ;;  %v611_v39 = vld [vmem:[#allocation7 + $0x24] sm:$0xf0]  ;;  %v610_v40 = vld [vmem:[#allocation7 + $0x24] sm:$0xf] }
  0x1e   :  { %125 = vmatpush.bf16.msra.mxu0 %v605_v16  ;;  %v496_v41 = vor.u32 %v611_v39, %v495_v38  ;;  %v497_v42 = vld [vmem:[#allocation7 + $0x28] sm:$0xf0]  ;;  %v487_v44 = vld [vmem:[#allocation7 + $0x10] sm:$0xf]  ;;  %v609_v45 = vld [vmem:[#allocation7 + $0x14] sm:$0xf0] }
  0x1f   :  { %v500_v43 = vor.u32 %v610_v40, %v497_v42  ;;  %v608_v46 = vld [vmem:[#allocation7 + $0x14] sm:$0xf]  ;;  %v488_v47 = vor.u32 %v609_v45, %v487_v44  ;;  %v489_v48 = vld [vmem:[#allocation7 + $0x18] sm:$0xf0]  ;;  %v479_v50 = vld [vmem:[#allocation7] sm:$0xf] }
  0x20   :  { %245 = vmatpush.bf16.msra.mxu1 %v520_v23  ;;  %v492_v49 = vor.u32 %v608_v46, %v489_v48  ;;  %v607_v51 = vld [vmem:[#allocation7 + $0x4] sm:$0xf0]  ;;  %v606_v52 = vld [vmem:[#allocation7 + $0x4] sm:$0xf]  ;;  %v481_v54 = vld [vmem:[#allocation7 + $0x8] sm:$0xf0] }
  0x21   :  { %476 = vmatmul.msk.bf16.vlgmr.msra.gmra.mxu0 %vm110_vm1, %v93_v19  ;;  %259 = vmatpush.bf16.msra.mxu2 %v524_v25  ;;  %v480_v53 = vor.u32 %v607_v51, %v479_v50  ;;  %v484_v55 = vor.u32 %v606_v52, %v481_v54  ;;  %v628_v57 = vld [vmem:[#allocation8 + $0x30] sm:$0xff]  ;;  %v647_v58 = vld [vmem:[%s873_s2] ss:$0 sm:$0xff]  ;;  %v627_v9 = vld [vmem:[#allocation8 + $0x28] sm:$0xff]  ;;  %s455_s26 = sshll.u32 %s797_s25, 4  ;;  %s456_s26 = int_to_ptr.vmem [resolvable:$true] %s455_s26 }
  0x22   :  { %422 = vmatpush.bf16.msra.mxu3 %v628_v57  ;;  %435 = vmatpush.bf16.msrb.mxu0 %v637_v8  ;;  %v636_v10 = vld [vmem:[#allocation8 + $0x70] sm:$0xff]  ;;  %v626_v11 = vld [vmem:[#allocation8 + $0x20] sm:$0xff]  ;;  %v635_v12 = vld [vmem:[#allocation8 + $0x68] sm:$0xff] }
  0x23   :  { %v625_v13 = vld [vmem:[#allocation8 + $0x18] sm:$0xff]  ;;  %v634_v14 = vld [vmem:[#allocation8 + $0x60] sm:$0xff]  ;;  %v624_v15 = vld [vmem:[#allocation8 + $0x10] sm:$0xff] }
  0x24   :  { %246 = vmatpush.bf16.msra.mxu1 %v512_v29  ;;  %v633_v16 = vld [vmem:[#allocation8 + $0x58] sm:$0xff]  ;;  %v623_v17 = vld [vmem:[#allocation8 + $0x8] sm:$0xff]  ;;  %v632_v18 = vld [vmem:[#allocation8 + $0x50] sm:$0xff] }
  0x25   :  { %260 = vmatpush.bf16.msra.mxu2 %v516_v31  ;;  %v622_v19 = vld [vmem:[#allocation8] sm:$0xff]  ;;  %v631_v20 = vld [vmem:[#allocation8 + $0x48] sm:$0xff] }
  0x26   :  { %423 = vmatpush.bf16.msra.mxu3 %v627_v9  ;;  %436 = vmatpush.bf16.msrb.mxu0 %v636_v10  ;;  %v157_v21 = vld [vmem:[%s875_s4] sm:$0x3] }
  0x27   :  { %v630_v22 = vld [vmem:[#allocation8 + $0x40] sm:$0xff]  ;;  %v159_v23 = vperm.slane %v157_v21, 0  ;;  %v160_v26 = vperm.slane %v157_v21, 1 }
  0x28   :  { %247 = vmatpush.bf16.msra.mxu1 %v504_v35  ;;  %v648_v51 = vld [vmem:[%s877_s6] ss:$0 sm:$0xff] }
  0x29   :  { %261 = vmatpush.bf16.msra.mxu2 %v508_v37 }
  0x2a   :  { %424 = vmatpush.bf16.msra.mxu3 %v626_v11  ;;  %437 = vmatpush.bf16.msrb.mxu0 %v635_v12 }
  0x2c   :  { %248 = vmatpush.bf16.msra.mxu1 %v496_v41 }
  0x2d   :  { %262 = vmatpush.bf16.msra.mxu2 %v500_v43 }
  0x2e   :  { %425 = vmatpush.bf16.msra.mxu3 %v625_v13  ;;  %438 = vmatpush.bf16.msrb.mxu0 %v634_v14 }
  0x30   :  { %249 = vmatpush.bf16.msra.mxu1 %v488_v47 }
  0x31   :  { %263 = vmatpush.bf16.msra.mxu2 %v492_v49 }
  0x32   :  { %426 = vmatpush.bf16.msra.mxu3 %v624_v15  ;;  %439 = vmatpush.bf16.msrb.mxu0 %v633_v16 }
  0x34   :  { %250 = vmatpush.bf16.msra.mxu1 %v480_v53 }
  0x35   :  { %264 = vmatpush.bf16.msra.mxu2 %v484_v55 }
  0x36   :  { %427 = vmatpush.bf16.msra.mxu3 %v623_v17  ;;  %440 = vmatpush.bf16.msrb.mxu0 %v632_v18 }
  0x3a   :  { %428 = vmatpush.bf16.msra.mxu3 %v622_v19  ;;  %441 = vmatpush.bf16.msrb.mxu0 %v631_v20 }
  0x3e   :  { %442 = vmatpush.bf16.msrb.mxu0 %v630_v22 }
  0x9e   :  { %v127_v59 = vpop.f32.mrf.mxu0 }
  0x9f   :  { %v128_v60 = vadd.f32 %v647_v58, %v127_v59 }
  0xa1   :  { %v132_v61 = vmul.f32 0.5, %v128_v60 }
  0xa3   :  { %649 = vtanh.f32 %v132_v61 }
  0xa6   :  { %v129_v62 = vpop.f32.mrf.mxu0 }
  0xa7   :  { %v130_v63 = vadd.f32 %v647_v58, %v129_v62 }
  0xa9   :  { %v133_v0 = vmul.f32 0.5, %v130_v63  ;;  %v650_v1 = vpop.eup %649 }
  0xaa   :  { %v136_v2 = vmul.f32 0.5, %v650_v1 }
  0xab   :  { %651 = vtanh.f32 %v133_v0 }
  0xac   :  { %v138_v5 = vadd.f32 0.5, %v136_v2 }
  0xb1   :  { %v652_v3 = vpop.eup %651 }
  0xb2   :  { %v137_v4 = vmul.f32 0.5, %v652_v3 }
  0xb4   :  { %v139_v6 = vadd.f32 0.5, %v137_v4 }
  0xb6   :  { %v140_v7 = vpack.c.bf16 %v139_v6, %v138_v5 }
  0xb8   :  { %251 = vmatmul.bf16.vlgmr.msra.gmra.mxu1 %v140_v7  ;;  %265 = vmatmul.bf16.vlgmr.msra.gmra.mxu2 %v140_v7 }
 0x135   :  { %v252_v24 = vpop.f32.mrf.mxu1 }
 0x136   :  { %v253_v25 = vadd.f32 %v252_v24, %v159_v23 }
 0x138   :  { %v271_v27 = vmul.f32 0.5, %v253_v25 }
 0x13a   :  { %653 = vtanh.f32 %v271_v27 }
 0x13b   :  { %v266_v28 = vpop.f32.mrf.mxu2 }
 0x13c   :  { %v267_v29 = vadd.f32 %v266_v28, %v160_v26 }
 0x13d   :  { %v254_v30 = vpop.f32.mrf.mxu1 }
 0x13e   :  { %v255_v31 = vadd.f32 %v254_v30, %v159_v23  ;;  %v272_v32 = vmul.f32 0.5, %v267_v29 }
 0x140   :  { %v273_v33 = vmul.f32 0.5, %v255_v31  ;;  %v654_v35 = vpop.eup %653 }
 0x141   :  { %v279_v38 = vmul.f32 0.5, %v654_v35 }
 0x142   :  { %655 = vtanh.f32 %v273_v33 }
 0x143   :  { %v268_v34 = vpop.f32.mrf.mxu2  ;;  %657 = vtanh.f32 %v272_v32  ;;  %v283_v42 = vadd.f32 0.5, %v279_v38 }
 0x144   :  { %v269_v36 = vadd.f32 %v268_v34, %v160_v26 }
 0x146   :  { %v274_v37 = vmul.f32 0.5, %v269_v36 }
 0x148   :  { %v656_v39 = vpop.eup %655  ;;  %659 = vtanh.f32 %v274_v37 }
 0x149   :  { %v281_v40 = vmul.f32 0.5, %v656_v39  ;;  %v658_v41 = vpop.eup %657 }
 0x14a   :  { %v280_v44 = vmul.f32 0.5, %v658_v41 }
 0x14b   :  { %v285_v43 = vadd.f32 0.5, %v281_v40 }
 0x14c   :  { %v284_v48 = vadd.f32 0.5, %v280_v44 }
 0x14d   :  { %v287_v45 = vpack.c.bf16 %v285_v43, %v283_v42 }
 0x14e   :  { %v660_v46 = vpop.eup %659 }
 0x14f   :  { %v282_v47 = vmul.f32 0.5, %v660_v46  ;;  %429 = vmatmul.bf16.vlgmr.msra.gmra.mxu3 %v287_v45 }
 0x151   :  { %v286_v49 = vadd.f32 0.5, %v282_v47 }
 0x153   :  { %v288_v50 = vpack.c.bf16 %v286_v49, %v284_v48 }
 0x155   :  { %443 = vmatmul.bf16.vlgmr.msrb.gmra.mxu0 %v288_v50 }
 0x1d2   :  { %v430_v52 = vpop.f32.mrf.mxu3  ;;  %v444_v53 = vpop.f32.mrf.mxu0 }
 0x1d3   :  { %v431_v54 = vadd.f32 %v648_v51, %v430_v52 }
 0x1d5   :  { %v445_v55 = vadd.f32 %v444_v53, %v431_v54 }
 0x1d7   :  { %449 = vst [vmem:[#allocation10] sm:$0xff] %v445_v55 }
 0x1da   :  { %v432_v56 = vpop.f32.mrf.mxu3  ;;  %v446_v58 = vpop.f32.mrf.mxu0 }
 0x1db   :  { %v433_v57 = vadd.f32 %v648_v51, %v432_v56 }
 0x1dd   :  { %v447_v59 = vadd.f32 %v446_v58, %v433_v57 }
 0x1df   :  { %450 = vst [vmem:[#allocation10 + $0x8] sm:$0xff] %v447_v59 }
 0x1e0   :  { %463 = dma.vmem_to_hbm [thread:$0]  %s456_s26, 256, %s458_s29, [#allocation4], %s793_s13, %s793_s13, %s794_s14  }
 0x1e1   :  { %787 = dma.done.wait [#allocation4], 256  }
 0x1e2   :  { %788 = vsyncadd [#allocation4], 4294967040 }
 0x1e3   :  { %468 = vsyncpa [#allocation3], 1 }
 0x1e4   :  { %469 = vsyncpa [#allocation6], 1 }
 0x1e5   :  { %470 = vsyncpa [#allocation9], 1 }
 0x1e6   :  { %471 = vsyncpa [#allocation4], 1 }

</bundles_post_ra>
